<compile_context>
chip_gen: v6e
topology: v6e:2x2x1
jax: 0.10.0
libtpu: 0.0.40
codegen_flags: <defaults>
</compile_context>

<pallas_src>
import functools

import jax
import jax.numpy as jnp
import numpy as np
from jax.experimental import pallas as pl
from jax.experimental.pallas import tpu as pltpu

# Small, shape-consistent hyper-parameters (model_3layer(N0, N1, N2, ndim)).
NUM_CLASSES = 3
N0, N1, N2, NDIM = 32, 16, 16, 3
TWO_PI = 2.0 * np.pi


def geodesic_kernel(xT_ref, wfT_ref, bf_ref, pool_ref,
                    w1t_ref, b1t_ref, w2t_ref, b2t_ref, w3t_ref, b3t_ref,
                    oneh_ref, yT_ref, *, num_classes, nonlinearity):
    """Single invocation: feature extractor + all K class heads + select + nonlin."""
    # Feature extractor stand-in: 1x1 conv (one 2-D matmul, lane-dense RHS) + ReLU.
    h = jnp.dot(wfT_ref[...], xT_ref[...],
                preferred_element_type=jnp.float32) + bf_ref[...]      # [N0, B*HW]
    h = jnp.maximum(h, 0.0)
    # Global average pool as a matmul (HW reduction stays on the MXU).
    feat_t = jnp.dot(h, pool_ref[...],
                     preferred_element_type=jnp.float32)               # [N0, B]

    ndim, bsz = yT_ref.shape
    yT = jnp.zeros((ndim, bsz), jnp.float32)
    # All K heads in one pass (K is tiny & static -> unrolled Python loop),
    # followed by the one-hot (bmm) selection as a masked sum.
    for k in range(num_classes):
        h1 = jnp.maximum(
            jnp.dot(w1t_ref[k], feat_t,
                    preferred_element_type=jnp.float32) + b1t_ref[k], 0.0)   # [N1, B]
        h2 = jnp.maximum(
            jnp.dot(w2t_ref[k], h1,
                    preferred_element_type=jnp.float32) + b2t_ref[k], 0.0)   # [N2, B]
        out_k = jnp.dot(w3t_ref[k], h2,
                        preferred_element_type=jnp.float32) + b3t_ref[k]     # [ndim, B]
        yT = yT + oneh_ref[k] * out_k                                        # [1,B] bcast

    if nonlinearity == 'valid':
        yT = jnp.pi * jnp.tanh(yT)
    elif nonlinearity == 'correct':
        # myProj: angle = fmod(||y||_2, 2*pi); axis = F.normalize(y); y = angle*axis
        angle = jnp.sqrt(jnp.sum(yT * yT, axis=0, keepdims=True))            # [1, B]
        axis = yT / jnp.maximum(angle, 1e-12)                                # eps of F.normalize
        angle = jnp.fmod(angle, TWO_PI)
        yT = angle * axis
    # else: identity

    yT_ref[...] = yT.astype(yT_ref.dtype)


def my_model_forward(x_nchw, label, params, nonlinearity='valid'):
    B, C, H, W = x_nchw.shape
    HW = H * W
    BHW = B * HW

    # Lane-dense layout for the kernel: the long dim (B*HW) goes last.
    xT = jnp.transpose(x_nchw, (1, 0, 2, 3)).reshape(C, BHW).astype(jnp.float32)

    wf = params['wf']                          # [C, N0]
    n0 = wf.shape[1]
    wfT = wf.T                                 # [N0, C]
    bf_col = params['bf'].reshape(n0, 1)       # [N0, 1]

    # Pooling matrix: pool[i, b] = 1/HW if row i belongs to batch b.
    pool = jnp.repeat(jnp.eye(B, dtype=jnp.float32), HW, axis=0) / float(HW)  # [BHW, B]

    # Head weights pre-transposed so the kernel never transposes in-kernel.
    w1t = jnp.transpose(params['w1'], (0, 2, 1))        # [K, N1, N0]
    w2t = jnp.transpose(params['w2'], (0, 2, 1))        # [K, N2, N1]
    w3t = jnp.transpose(params['w3'], (0, 2, 1))        # [K, ndim, N2]
    b1t = params['b1'][:, :, None]                      # [K, N1, 1]
    b2t = params['b2'][:, :, None]                      # [K, N2, 1]
    b3t = params['b3'][:, :, None]                      # [K, ndim, 1]

    K = w1t.shape[0]
    n1 = w1t.shape[1]
    n2 = w2t.shape[1]
    ndim = w3t.shape[1]

    # torch.zeros(B, K).scatter_(1, label, 1.0) == one-hot over classes.
    onehot = jax.nn.one_hot(label[:, 0], K, dtype=jnp.float32)   # [B, K]
    onehot_t = onehot.T[:, None, :]                              # [K, 1, B]

    kernel = functools.partial(geodesic_kernel,
                               num_classes=K, nonlinearity=nonlinearity)

    yT = pl.pallas_call(
        kernel,
        out_shape=jax.ShapeDtypeStruct((ndim, B), jnp.float32),
        grid=(1,),
        in_specs=[
            pl.BlockSpec((C, BHW), lambda i: (0, 0)),            # xT
            pl.BlockSpec((n0, C), lambda i: (0, 0)),             # wfT
            pl.BlockSpec((n0, 1), lambda i: (0, 0)),             # bf
            pl.BlockSpec((BHW, B), lambda i: (0, 0)),            # pool
            pl.BlockSpec((K, n1, n0), lambda i: (0, 0, 0)),      # w1t
            pl.BlockSpec((K, n1, 1), lambda i: (0, 0, 0)),       # b1t
            pl.BlockSpec((K, n2, n1), lambda i: (0, 0, 0)),      # w2t
            pl.BlockSpec((K, n2, 1), lambda i: (0, 0, 0)),       # b2t
            pl.BlockSpec((K, ndim, n2), lambda i: (0, 0, 0)),    # w3t
            pl.BlockSpec((K, ndim, 1), lambda i: (0, 0, 0)),     # b3t
            pl.BlockSpec((K, 1, B), lambda i: (0, 0, 0)),        # onehot
        ],
        out_specs=pl.BlockSpec((ndim, B), lambda i: (0, 0)),
        compiler_params=pltpu.CompilerParams(
            dimension_semantics=("arbitrary",)),
    )(xT, wfT, bf_col, pool, w1t, b1t, w2t, b2t, w3t, b3t, onehot_t)

    return yT.T                                                  # [B, ndim]


def init_params(cin, key):
    ks = jax.random.split(key, 8)

    def lin(k, fan_in, shape):
        return (jax.random.normal(k, shape, jnp.float32) / np.sqrt(fan_in)).astype(jnp.float32)

    return {
        'wf': lin(ks[0], cin, (cin, N0)),
        'bf': jnp.zeros((N0,), jnp.float32),
        'w1': lin(ks[1], N0, (NUM_CLASSES, N0, N1)),
        'b1': lin(ks[2], N0, (NUM_CLASSES, N1)),
        'w2': lin(ks[3], N1, (NUM_CLASSES, N1, N2)),
        'b2': lin(ks[4], N1, (NUM_CLASSES, N2)),
        'w3': lin(ks[5], N2, (NUM_CLASSES, N2, NDIM)),
        'b3': lin(ks[6], N2, (NUM_CLASSES, NDIM)),
    }


def reference_forward(x_nchw, label, params, nonlinearity='valid'):
    """Pure-JAX mirror of the PyTorch forward, for correctness checking."""
    B, C, H, W = x_nchw.shape
    x = jnp.transpose(x_nchw, (0, 2, 3, 1)).reshape(B, H * W, C).astype(jnp.float32)
    h = jnp.einsum('bhc,cf->bhf', x, params['wf']) + params['bf']
    feat = jnp.mean(jnp.maximum(h, 0.0), axis=1)                  # [B, N0]

    outs = []
    for k in range(NUM_CLASSES):
        h1 = jnp.maximum(feat @ params['w1'][k] + params['b1'][k], 0.0)
        h2 = jnp.maximum(h1 @ params['w2'][k] + params['b2'][k], 0.0)
        outs.append(h2 @ params['w3'][k] + params['b3'][k])
    x_stack = jnp.stack(outs).transpose(1, 2, 0)                  # [B, ndim, K]

    onehot = jax.nn.one_hot(label[:, 0], NUM_CLASSES, dtype=jnp.float32)
    y = jnp.einsum('bdk,bk->bd', x_stack, onehot)                 # bmm + squeeze

    if nonlinearity == 'valid':
        y = jnp.pi * jnp.tanh(y)
    elif nonlinearity == 'correct':
        angle = jnp.sqrt(jnp.sum(y * y, axis=1, keepdims=True))
        axis = y / jnp.maximum(angle, 1e-12)
        angle = jnp.fmod(angle, TWO_PI)
        y = angle * axis
    return y


if __name__ == "__main__":
    B, C, H, W = 2, 4, 16, 16
    key = jax.random.PRNGKey(0)
    kx, kp = jax.random.split(key)
    x = jax.random.normal(kx, (B, C, H, W), jnp.float32)
    label = jnp.array([[0], [2]], dtype=jnp.int32)                # [B, 1], like PyTorch

    params = init_params(C, kp)

    for nl in ('valid', 'correct'):
        y = my_model_forward(x, label, params, nonlinearity=nl)
        y = jax.block_until_ready(y)
        y_ref = reference_forward(x, label, params, nonlinearity=nl)
        np.testing.assert_allclose(np.asarray(y), np.asarray(y_ref),
                                   rtol=1e-4, atol=1e-5)

    print("KERNEL_OK")
</pallas_src>

<mosaic_0001>
module attributes {stable_mosaic.version = 11 : i64} {
  func.func @geodesic_kernel(%arg0: i32, %arg1: memref<4x512xf32, #tpu.memory_space<vmem>>, %arg2: memref<32x4xf32, #tpu.memory_space<vmem>>, %arg3: memref<32x1xf32, #tpu.memory_space<vmem>>, %arg4: memref<512x2xf32, #tpu.memory_space<vmem>>, %arg5: memref<3x16x32xf32, #tpu.memory_space<vmem>>, %arg6: memref<3x16x1xf32, #tpu.memory_space<vmem>>, %arg7: memref<3x16x16xf32, #tpu.memory_space<vmem>>, %arg8: memref<3x16x1xf32, #tpu.memory_space<vmem>>, %arg9: memref<3x3x16xf32, #tpu.memory_space<vmem>>, %arg10: memref<3x3x1xf32, #tpu.memory_space<vmem>>, %arg11: memref<3x1x2xf32, #tpu.memory_space<vmem>>, %arg12: memref<3x2xf32, #tpu.memory_space<vmem>>) attributes {dimension_semantics = [#tpu.dimension_semantics<arbitrary>], iteration_bounds = array<i64: 1>, scalar_prefetch = 0 : i64, scratch_operands = 0 : i64, tpu.core_type = #tpu.core_type<tc>, window_params = [{pipeline_mode = #tpu.pipeline_mode<synchronous>, transform_indices = @transform_0, window_bounds = array<i64: 4, 512>}, {pipeline_mode = #tpu.pipeline_mode<synchronous>, transform_indices = @transform_1, window_bounds = array<i64: 32, 4>}, {pipeline_mode = #tpu.pipeline_mode<synchronous>, transform_indices = @transform_2, window_bounds = array<i64: 32, 1>}, {pipeline_mode = #tpu.pipeline_mode<synchronous>, transform_indices = @transform_3, window_bounds = array<i64: 512, 2>}, {pipeline_mode = #tpu.pipeline_mode<synchronous>, transform_indices = @transform_4, window_bounds = array<i64: 3, 16, 32>}, {pipeline_mode = #tpu.pipeline_mode<synchronous>, transform_indices = @transform_5, window_bounds = array<i64: 3, 16, 1>}, {pipeline_mode = #tpu.pipeline_mode<synchronous>, transform_indices = @transform_6, window_bounds = array<i64: 3, 16, 16>}, {pipeline_mode = #tpu.pipeline_mode<synchronous>, transform_indices = @transform_7, window_bounds = array<i64: 3, 16, 1>}, {pipeline_mode = #tpu.pipeline_mode<synchronous>, transform_indices = @transform_8, window_bounds = array<i64: 3, 3, 16>}, {pipeline_mode = #tpu.pipeline_mode<synchronous>, transform_indices = @transform_9, window_bounds = array<i64: 3, 3, 1>}, {pipeline_mode = #tpu.pipeline_mode<synchronous>, transform_indices = @transform_10, window_bounds = array<i64: 3, 1, 2>}, {pipeline_mode = #tpu.pipeline_mode<synchronous>, transform_indices = @transform_11, window_bounds = array<i64: 3, 2>}]} {
    %c0 = arith.constant 0 : index
    %c0_0 = arith.constant 0 : index
    %0 = vector.load %arg2[%c0, %c0_0] : memref<32x4xf32, #tpu.memory_space<vmem>>, vector<32x4xf32>
    %c0_1 = arith.constant 0 : index
    %c0_2 = arith.constant 0 : index
    %1 = vector.load %arg1[%c0_1, %c0_2] : memref<4x512xf32, #tpu.memory_space<vmem>>, vector<4x512xf32>
    %cst = arith.constant dense<0.000000e+00> : vector<32x512xf32>
    %2 = tpu.matmul %0, %1, %cst {dimension_numbers = #tpu.dot_dimension_numbers<[1], [0], [0], [1], [0, 0, 1, 1], [], []>} : vector<32x4xf32>, vector<4x512xf32>, vector<32x512xf32> -> vector<32x512xf32>
    %c0_3 = arith.constant 0 : index
    %c0_4 = arith.constant 0 : index
    %3 = vector.load %arg3[%c0_3, %c0_4] : memref<32x1xf32, #tpu.memory_space<vmem>>, vector<32x1xf32>
    %4 = vector.broadcast %3 : vector<32x1xf32> to vector<32x512xf32>
    %5 = arith.addf %2, %4 : vector<32x512xf32>
    %cst_5 = arith.constant 0.000000e+00 : f32
    %6 = vector.broadcast %cst_5 : f32 to vector<32x512xf32>
    %7 = arith.maximumf %5, %6 : vector<32x512xf32>
    %c0_6 = arith.constant 0 : index
    %c0_7 = arith.constant 0 : index
    %8 = vector.load %arg4[%c0_6, %c0_7] : memref<512x2xf32, #tpu.memory_space<vmem>>, vector<512x2xf32>
    %cst_8 = arith.constant dense<0.000000e+00> : vector<32x2xf32>
    %9 = tpu.matmul %7, %8, %cst_8 {dimension_numbers = #tpu.dot_dimension_numbers<[1], [0], [0], [1], [0, 0, 1, 1], [], []>} : vector<32x512xf32>, vector<512x2xf32>, vector<32x2xf32> -> vector<32x2xf32>
    %cst_9 = arith.constant 0.000000e+00 : f32
    %10 = vector.broadcast %cst_9 : f32 to vector<3x2xf32>
    %c0_10 = arith.constant 0 : index
    %c0_11 = arith.constant 0 : index
    %c0_12 = arith.constant 0 : index
    %11 = vector.load %arg5[%c0_10, %c0_11, %c0_12] : memref<3x16x32xf32, #tpu.memory_space<vmem>>, vector<1x16x32xf32>
    %12 = vector.shape_cast %11 : vector<1x16x32xf32> to vector<16x32xf32>
    %cst_13 = arith.constant dense<0.000000e+00> : vector<16x2xf32>
    %13 = tpu.matmul %12, %9, %cst_13 {dimension_numbers = #tpu.dot_dimension_numbers<[1], [0], [0], [1], [0, 0, 1, 1], [], []>} : vector<16x32xf32>, vector<32x2xf32>, vector<16x2xf32> -> vector<16x2xf32>
    %c0_14 = arith.constant 0 : index
    %c0_15 = arith.constant 0 : index
    %c0_16 = arith.constant 0 : index
    %14 = vector.load %arg6[%c0_14, %c0_15, %c0_16] : memref<3x16x1xf32, #tpu.memory_space<vmem>>, vector<1x16x1xf32>
    %15 = vector.shape_cast %14 : vector<1x16x1xf32> to vector<16x1xf32>
    %16 = vector.broadcast %15 : vector<16x1xf32> to vector<16x2xf32>
    %17 = arith.addf %13, %16 : vector<16x2xf32>
    %cst_17 = arith.constant 0.000000e+00 : f32
    %18 = vector.broadcast %cst_17 : f32 to vector<16x2xf32>
    %19 = arith.maximumf %17, %18 : vector<16x2xf32>
    %c0_18 = arith.constant 0 : index
    %c0_19 = arith.constant 0 : index
    %c0_20 = arith.constant 0 : index
    %20 = vector.load %arg7[%c0_18, %c0_19, %c0_20] : memref<3x16x16xf32, #tpu.memory_space<vmem>>, vector<1x16x16xf32>
    %21 = vector.shape_cast %20 : vector<1x16x16xf32> to vector<16x16xf32>
    %cst_21 = arith.constant dense<0.000000e+00> : vector<16x2xf32>
    %22 = tpu.matmul %21, %19, %cst_21 {dimension_numbers = #tpu.dot_dimension_numbers<[1], [0], [0], [1], [0, 0, 1, 1], [], []>} : vector<16x16xf32>, vector<16x2xf32>, vector<16x2xf32> -> vector<16x2xf32>
    %c0_22 = arith.constant 0 : index
    %c0_23 = arith.constant 0 : index
    %c0_24 = arith.constant 0 : index
    %23 = vector.load %arg8[%c0_22, %c0_23, %c0_24] : memref<3x16x1xf32, #tpu.memory_space<vmem>>, vector<1x16x1xf32>
    %24 = vector.shape_cast %23 : vector<1x16x1xf32> to vector<16x1xf32>
    %25 = vector.broadcast %24 : vector<16x1xf32> to vector<16x2xf32>
    %26 = arith.addf %22, %25 : vector<16x2xf32>
    %cst_25 = arith.constant 0.000000e+00 : f32
    %27 = vector.broadcast %cst_25 : f32 to vector<16x2xf32>
    %28 = arith.maximumf %26, %27 : vector<16x2xf32>
    %c0_26 = arith.constant 0 : index
    %c0_27 = arith.constant 0 : index
    %c0_28 = arith.constant 0 : index
    %29 = vector.load %arg9[%c0_26, %c0_27, %c0_28] : memref<3x3x16xf32, #tpu.memory_space<vmem>>, vector<1x3x16xf32>
    %30 = vector.shape_cast %29 : vector<1x3x16xf32> to vector<3x16xf32>
    %cst_29 = arith.constant dense<0.000000e+00> : vector<3x2xf32>
    %31 = tpu.matmul %30, %28, %cst_29 {dimension_numbers = #tpu.dot_dimension_numbers<[1], [0], [0], [1], [0, 0, 1, 1], [], []>} : vector<3x16xf32>, vector<16x2xf32>, vector<3x2xf32> -> vector<3x2xf32>
    %c0_30 = arith.constant 0 : index
    %c0_31 = arith.constant 0 : index
    %c0_32 = arith.constant 0 : index
    %32 = vector.load %arg10[%c0_30, %c0_31, %c0_32] : memref<3x3x1xf32, #tpu.memory_space<vmem>>, vector<1x3x1xf32>
    %33 = vector.shape_cast %32 : vector<1x3x1xf32> to vector<3x1xf32>
    %34 = vector.broadcast %33 : vector<3x1xf32> to vector<3x2xf32>
    %35 = arith.addf %31, %34 : vector<3x2xf32>
    %c0_33 = arith.constant 0 : index
    %c0_34 = arith.constant 0 : index
    %c0_35 = arith.constant 0 : index
    %36 = vector.load %arg11[%c0_33, %c0_34, %c0_35] : memref<3x1x2xf32, #tpu.memory_space<vmem>>, vector<1x1x2xf32>
    %37 = vector.shape_cast %36 : vector<1x1x2xf32> to vector<1x2xf32>
    %38 = vector.broadcast %37 : vector<1x2xf32> to vector<3x2xf32>
    %39 = arith.mulf %38, %35 : vector<3x2xf32>
    %40 = arith.addf %10, %39 : vector<3x2xf32>
    %c1 = arith.constant 1 : index
    %c0_36 = arith.constant 0 : index
    %c0_37 = arith.constant 0 : index
    %41 = vector.load %arg5[%c1, %c0_36, %c0_37] : memref<3x16x32xf32, #tpu.memory_space<vmem>>, vector<1x16x32xf32>
    %42 = vector.shape_cast %41 : vector<1x16x32xf32> to vector<16x32xf32>
    %cst_38 = arith.constant dense<0.000000e+00> : vector<16x2xf32>
    %43 = tpu.matmul %42, %9, %cst_38 {dimension_numbers = #tpu.dot_dimension_numbers<[1], [0], [0], [1], [0, 0, 1, 1], [], []>} : vector<16x32xf32>, vector<32x2xf32>, vector<16x2xf32> -> vector<16x2xf32>
    %c1_39 = arith.constant 1 : index
    %c0_40 = arith.constant 0 : index
    %c0_41 = arith.constant 0 : index
    %44 = vector.load %arg6[%c1_39, %c0_40, %c0_41] : memref<3x16x1xf32, #tpu.memory_space<vmem>>, vector<1x16x1xf32>
    %45 = vector.shape_cast %44 : vector<1x16x1xf32> to vector<16x1xf32>
    %46 = vector.broadcast %45 : vector<16x1xf32> to vector<16x2xf32>
    %47 = arith.addf %43, %46 : vector<16x2xf32>
    %cst_42 = arith.constant 0.000000e+00 : f32
    %48 = vector.broadcast %cst_42 : f32 to vector<16x2xf32>
    %49 = arith.maximumf %47, %48 : vector<16x2xf32>
    %c1_43 = arith.constant 1 : index
    %c0_44 = arith.constant 0 : index
    %c0_45 = arith.constant 0 : index
    %50 = vector.load %arg7[%c1_43, %c0_44, %c0_45] : memref<3x16x16xf32, #tpu.memory_space<vmem>>, vector<1x16x16xf32>
    %51 = vector.shape_cast %50 : vector<1x16x16xf32> to vector<16x16xf32>
    %cst_46 = arith.constant dense<0.000000e+00> : vector<16x2xf32>
    %52 = tpu.matmul %51, %49, %cst_46 {dimension_numbers = #tpu.dot_dimension_numbers<[1], [0], [0], [1], [0, 0, 1, 1], [], []>} : vector<16x16xf32>, vector<16x2xf32>, vector<16x2xf32> -> vector<16x2xf32>
    %c1_47 = arith.constant 1 : index
    %c0_48 = arith.constant 0 : index
    %c0_49 = arith.constant 0 : index
    %53 = vector.load %arg8[%c1_47, %c0_48, %c0_49] : memref<3x16x1xf32, #tpu.memory_space<vmem>>, vector<1x16x1xf32>
    %54 = vector.shape_cast %53 : vector<1x16x1xf32> to vector<16x1xf32>
    %55 = vector.broadcast %54 : vector<16x1xf32> to vector<16x2xf32>
    %56 = arith.addf %52, %55 : vector<16x2xf32>
    %cst_50 = arith.constant 0.000000e+00 : f32
    %57 = vector.broadcast %cst_50 : f32 to vector<16x2xf32>
    %58 = arith.maximumf %56, %57 : vector<16x2xf32>
    %c1_51 = arith.constant 1 : index
    %c0_52 = arith.constant 0 : index
    %c0_53 = arith.constant 0 : index
    %59 = vector.load %arg9[%c1_51, %c0_52, %c0_53] : memref<3x3x16xf32, #tpu.memory_space<vmem>>, vector<1x3x16xf32>
    %60 = vector.shape_cast %59 : vector<1x3x16xf32> to vector<3x16xf32>
    %cst_54 = arith.constant dense<0.000000e+00> : vector<3x2xf32>
    %61 = tpu.matmul %60, %58, %cst_54 {dimension_numbers = #tpu.dot_dimension_numbers<[1], [0], [0], [1], [0, 0, 1, 1], [], []>} : vector<3x16xf32>, vector<16x2xf32>, vector<3x2xf32> -> vector<3x2xf32>
    %c1_55 = arith.constant 1 : index
    %c0_56 = arith.constant 0 : index
    %c0_57 = arith.constant 0 : index
    %62 = vector.load %arg10[%c1_55, %c0_56, %c0_57] : memref<3x3x1xf32, #tpu.memory_space<vmem>>, vector<1x3x1xf32>
    %63 = vector.shape_cast %62 : vector<1x3x1xf32> to vector<3x1xf32>
    %64 = vector.broadcast %63 : vector<3x1xf32> to vector<3x2xf32>
    %65 = arith.addf %61, %64 : vector<3x2xf32>
    %c1_58 = arith.constant 1 : index
    %c0_59 = arith.constant 0 : index
    %c0_60 = arith.constant 0 : index
    %66 = vector.load %arg11[%c1_58, %c0_59, %c0_60] : memref<3x1x2xf32, #tpu.memory_space<vmem>>, vector<1x1x2xf32>
    %67 = vector.shape_cast %66 : vector<1x1x2xf32> to vector<1x2xf32>
    %68 = vector.broadcast %67 : vector<1x2xf32> to vector<3x2xf32>
    %69 = arith.mulf %68, %65 : vector<3x2xf32>
    %70 = arith.addf %40, %69 : vector<3x2xf32>
    %c2 = arith.constant 2 : index
    %c0_61 = arith.constant 0 : index
    %c0_62 = arith.constant 0 : index
    %71 = vector.load %arg5[%c2, %c0_61, %c0_62] : memref<3x16x32xf32, #tpu.memory_space<vmem>>, vector<1x16x32xf32>
    %72 = vector.shape_cast %71 : vector<1x16x32xf32> to vector<16x32xf32>
    %cst_63 = arith.constant dense<0.000000e+00> : vector<16x2xf32>
    %73 = tpu.matmul %72, %9, %cst_63 {dimension_numbers = #tpu.dot_dimension_numbers<[1], [0], [0], [1], [0, 0, 1, 1], [], []>} : vector<16x32xf32>, vector<32x2xf32>, vector<16x2xf32> -> vector<16x2xf32>
    %c2_64 = arith.constant 2 : index
    %c0_65 = arith.constant 0 : index
    %c0_66 = arith.constant 0 : index
    %74 = vector.load %arg6[%c2_64, %c0_65, %c0_66] : memref<3x16x1xf32, #tpu.memory_space<vmem>>, vector<1x16x1xf32>
    %75 = vector.shape_cast %74 : vector<1x16x1xf32> to vector<16x1xf32>
    %76 = vector.broadcast %75 : vector<16x1xf32> to vector<16x2xf32>
    %77 = arith.addf %73, %76 : vector<16x2xf32>
    %cst_67 = arith.constant 0.000000e+00 : f32
    %78 = vector.broadcast %cst_67 : f32 to vector<16x2xf32>
    %79 = arith.maximumf %77, %78 : vector<16x2xf32>
    %c2_68 = arith.constant 2 : index
    %c0_69 = arith.constant 0 : index
    %c0_70 = arith.constant 0 : index
    %80 = vector.load %arg7[%c2_68, %c0_69, %c0_70] : memref<3x16x16xf32, #tpu.memory_space<vmem>>, vector<1x16x16xf32>
    %81 = vector.shape_cast %80 : vector<1x16x16xf32> to vector<16x16xf32>
    %cst_71 = arith.constant dense<0.000000e+00> : vector<16x2xf32>
    %82 = tpu.matmul %81, %79, %cst_71 {dimension_numbers = #tpu.dot_dimension_numbers<[1], [0], [0], [1], [0, 0, 1, 1], [], []>} : vector<16x16xf32>, vector<16x2xf32>, vector<16x2xf32> -> vector<16x2xf32>
    %c2_72 = arith.constant 2 : index
    %c0_73 = arith.constant 0 : index
    %c0_74 = arith.constant 0 : index
    %83 = vector.load %arg8[%c2_72, %c0_73, %c0_74] : memref<3x16x1xf32, #tpu.memory_space<vmem>>, vector<1x16x1xf32>
    %84 = vector.shape_cast %83 : vector<1x16x1xf32> to vector<16x1xf32>
    %85 = vector.broadcast %84 : vector<16x1xf32> to vector<16x2xf32>
    %86 = arith.addf %82, %85 : vector<16x2xf32>
    %cst_75 = arith.constant 0.000000e+00 : f32
    %87 = vector.broadcast %cst_75 : f32 to vector<16x2xf32>
    %88 = arith.maximumf %86, %87 : vector<16x2xf32>
    %c2_76 = arith.constant 2 : index
    %c0_77 = arith.constant 0 : index
    %c0_78 = arith.constant 0 : index
    %89 = vector.load %arg9[%c2_76, %c0_77, %c0_78] : memref<3x3x16xf32, #tpu.memory_space<vmem>>, vector<1x3x16xf32>
    %90 = vector.shape_cast %89 : vector<1x3x16xf32> to vector<3x16xf32>
    %cst_79 = arith.constant dense<0.000000e+00> : vector<3x2xf32>
    %91 = tpu.matmul %90, %88, %cst_79 {dimension_numbers = #tpu.dot_dimension_numbers<[1], [0], [0], [1], [0, 0, 1, 1], [], []>} : vector<3x16xf32>, vector<16x2xf32>, vector<3x2xf32> -> vector<3x2xf32>
    %c2_80 = arith.constant 2 : index
    %c0_81 = arith.constant 0 : index
    %c0_82 = arith.constant 0 : index
    %92 = vector.load %arg10[%c2_80, %c0_81, %c0_82] : memref<3x3x1xf32, #tpu.memory_space<vmem>>, vector<1x3x1xf32>
    %93 = vector.shape_cast %92 : vector<1x3x1xf32> to vector<3x1xf32>
    %94 = vector.broadcast %93 : vector<3x1xf32> to vector<3x2xf32>
    %95 = arith.addf %91, %94 : vector<3x2xf32>
    %c2_83 = arith.constant 2 : index
    %c0_84 = arith.constant 0 : index
    %c0_85 = arith.constant 0 : index
    %96 = vector.load %arg11[%c2_83, %c0_84, %c0_85] : memref<3x1x2xf32, #tpu.memory_space<vmem>>, vector<1x1x2xf32>
    %97 = vector.shape_cast %96 : vector<1x1x2xf32> to vector<1x2xf32>
    %98 = vector.broadcast %97 : vector<1x2xf32> to vector<3x2xf32>
    %99 = arith.mulf %98, %95 : vector<3x2xf32>
    %100 = arith.addf %70, %99 : vector<3x2xf32>
    %101 = math.tanh %100 : vector<3x2xf32>
    %cst_86 = arith.constant 3.14159274 : f32
    %102 = vector.broadcast %cst_86 : f32 to vector<3x2xf32>
    %103 = arith.mulf %102, %101 : vector<3x2xf32>
    %c0_87 = arith.constant 0 : index
    %c0_88 = arith.constant 0 : index
    %104 = vector.load %arg12[%c0_87, %c0_88] : memref<3x2xf32, #tpu.memory_space<vmem>>, vector<3x2xf32>
    tpu.vector_store %arg12[%c0_87, %c0_88], %103 {strides = array<i32>} : memref<3x2xf32, #tpu.memory_space<vmem>>, vector<3x2xf32>,
    return
  }
  func.func @transform_0(%arg0: i32) -> (i32, i32) {
    %c0_i32 = arith.constant 0 : i32
    %c0_i32_0 = arith.constant 0 : i32
    %c0_i32_1 = arith.constant 0 : i32
    return %c0_i32, %c0_i32_0 : i32, i32
  }
  func.func @transform_1(%arg0: i32) -> (i32, i32) {
    %c0_i32 = arith.constant 0 : i32
    %c0_i32_0 = arith.constant 0 : i32
    %c0_i32_1 = arith.constant 0 : i32
    return %c0_i32, %c0_i32_0 : i32, i32
  }
  func.func @transform_2(%arg0: i32) -> (i32, i32) {
    %c0_i32 = arith.constant 0 : i32
    %c0_i32_0 = arith.constant 0 : i32
    %c0_i32_1 = arith.constant 0 : i32
    return %c0_i32, %c0_i32_0 : i32, i32
  }
  func.func @transform_3(%arg0: i32) -> (i32, i32) {
    %c0_i32 = arith.constant 0 : i32
    %c0_i32_0 = arith.constant 0 : i32
    %c0_i32_1 = arith.constant 0 : i32
    return %c0_i32, %c0_i32_0 : i32, i32
  }
  func.func @transform_4(%arg0: i32) -> (i32, i32, i32) {
    %c0_i32 = arith.constant 0 : i32
    %c0_i32_0 = arith.constant 0 : i32
    %c0_i32_1 = arith.constant 0 : i32
    %c0_i32_2 = arith.constant 0 : i32
    return %c0_i32, %c0_i32_0, %c0_i32_1 : i32, i32, i32
  }
  func.func @transform_5(%arg0: i32) -> (i32, i32, i32) {
    %c0_i32 = arith.constant 0 : i32
    %c0_i32_0 = arith.constant 0 : i32
    %c0_i32_1 = arith.constant 0 : i32
    %c0_i32_2 = arith.constant 0 : i32
    return %c0_i32, %c0_i32_0, %c0_i32_1 : i32, i32, i32
  }
  func.func @transform_6(%arg0: i32) -> (i32, i32, i32) {
    %c0_i32 = arith.constant 0 : i32
    %c0_i32_0 = arith.constant 0 : i32
    %c0_i32_1 = arith.constant 0 : i32
    %c0_i32_2 = arith.constant 0 : i32
    return %c0_i32, %c0_i32_0, %c0_i32_1 : i32, i32, i32
  }
  func.func @transform_7(%arg0: i32) -> (i32, i32, i32) {
    %c0_i32 = arith.constant 0 : i32
    %c0_i32_0 = arith.constant 0 : i32
    %c0_i32_1 = arith.constant 0 : i32
    %c0_i32_2 = arith.constant 0 : i32
    return %c0_i32, %c0_i32_0, %c0_i32_1 : i32, i32, i32
  }
  func.func @transform_8(%arg0: i32) -> (i32, i32, i32) {
    %c0_i32 = arith.constant 0 : i32
    %c0_i32_0 = arith.constant 0 : i32
    %c0_i32_1 = arith.constant 0 : i32
    %c0_i32_2 = arith.constant 0 : i32
    return %c0_i32, %c0_i32_0, %c0_i32_1 : i32, i32, i32
  }
  func.func @transform_9(%arg0: i32) -> (i32, i32, i32) {
    %c0_i32 = arith.constant 0 : i32
    %c0_i32_0 = arith.constant 0 : i32
    %c0_i32_1 = arith.constant 0 : i32
    %c0_i32_2 = arith.constant 0 : i32
    return %c0_i32, %c0_i32_0, %c0_i32_1 : i32, i32, i32
  }
  func.func @transform_10(%arg0: i32) -> (i32, i32, i32) {
    %c0_i32 = arith.constant 0 : i32
    %c0_i32_0 = arith.constant 0 : i32
    %c0_i32_1 = arith.constant 0 : i32
    %c0_i32_2 = arith.constant 0 : i32
    return %c0_i32, %c0_i32_0, %c0_i32_1 : i32, i32, i32
  }
  func.func @transform_11(%arg0: i32) -> (i32, i32) {
    %c0_i32 = arith.constant 0 : i32
    %c0_i32_0 = arith.constant 0 : i32
    %c0_i32_1 = arith.constant 0 : i32
    return %c0_i32, %c0_i32_0 : i32, i32
  }
}

</mosaic_0001>

<bundles_post_ra>
// kernel: tpu_custom_call.1
= control target key start
LH: loop header
LB: loop body
LE: loop exit
PB: predicated region body
PF: predicated region fallthrough
CT: control target
= control target key end

     0   :  { %vm85_vm0 = vcmask 1043456   ;;  %v1658_v2 = vmov 0.0   ;;  %v1659_v5 = vmov 0   ;;  %vm72_vm1 = vcmask 31744   ;;  %s2092_s0 = inlined_call_operand.vmem [shape: f32[4,512], index: 0, kind: input, shape index: {}]   ;;  %s2093_s1 = inlined_call_operand.vmem [shape: f32[32,4], index: 1, kind: input, shape index: {}]   ;;  %s2094_s2 = inlined_call_operand.vmem [shape: f32[32,1], index: 2, kind: input, shape index: {}]   ;;  %s2095_s5 = inlined_call_operand.vmem [shape: f32[3,16,1], index: 5, kind: input, shape index: {}]   ;;  %s2096_s3 = inlined_call_operand.vmem [shape: f32[512,2], index: 3, kind: input, shape index: {}]   ;;  %s2097_s7 = inlined_call_operand.vmem [shape: f32[3,16,1], index: 7, kind: input, shape index: {}]   ;;  %s2098_s9 = inlined_call_operand.vmem [shape: f32[3,3,1], index: 9, kind: input, shape index: {}]   ;;  %s2099_s4 = inlined_call_operand.vmem [shape: f32[3,16,32], index: 4, kind: input, shape index: {}]   ;;  %s2100_s6 = inlined_call_operand.vmem [shape: f32[3,16,16], index: 6, kind: input, shape index: {}]   ;;  %s2101_s8 = inlined_call_operand.vmem [shape: f32[3,3,16], index: 8, kind: input, shape index: {}]   ;;  %s2102_s10 = inlined_call_operand.vmem [shape: f32[3,1,2], index: 10, kind: input, shape index: {}]   ;;  %s2103_s11 = inlined_call_operand.vmem [shape: f32[3,2], index: 11, kind: output, shape index: {}]  }
   0x1   :  { %v42_v0 = vld [vmem:[%s2092_s0] sm:$0xff]  ;;  %v43_v1 = vld [vmem:[%s2092_s0 + $0x8] sm:$0xff]  ;;  %158 = vmatprep.mubr.f32.mxu0 %v1658_v2  ;;  %247 = vmatprep.mubr.f32.mxu1 %v1658_v2  ;;  %v46_v8 = vld [vmem:[%s2094_s2 + $0x10] sm:$0xff]  ;;  %vm536_vm2 = vcmask 261120   ;;  %vm634_vm3 = vcmask 130048   ;;  %vm1660_vm4 = vmmov 0  }
   0x2   :  { %v70_v3 = vcombine.high %v42_v0, %v42_v0  ;;  %v71_v4 = vcombine.high %v43_v1, %v43_v1  ;;  %1652 = vset.pattern.permute.xlu0 %v1659_v5  ;;  %1653 = vset.pattern.permute.xlu1 %v1659_v5  ;;  %v38_v6 = vld [vmem:[%s2093_s1] sm:$0xff]  ;;  %v39_v9 = vld [vmem:[%s2093_s1 + $0x8] sm:$0xff]  ;;  %v47_v11 = vld [vmem:[%s2094_s2 + $0x18] sm:$0xff]  ;;  %vm1389_vm5 = vcmask 10240  }
   0x3   :  { %v44_v7 = vld [vmem:[%s2094_s2] sm:$0xff]  ;;  %60 = vperm.xlu1 %1653, %v46_v8   ;;  %v45_v10 = vld [vmem:[%s2094_s2 + $0x8] sm:$0xff]  ;;  %v40_v12 = vld [vmem:[%s2093_s1 + $0x10] sm:$0xff] }
   0x4   :  { %1395 = vmatprep.subr.msk.mxu0 %vm85_vm0, %v70_v3  ;;  %1401 = vmatprep.subr.msk.mxu1 %vm85_vm0, %v71_v4  ;;  %v319_v13 = vld [vmem:[%s2096_s3 + $0xf8] sm:$0xff]  ;;  %v525_v15 = vld [vmem:[%s2095_s5 + $0x8] sm:$0xff]  ;;  %v524_v16 = vld [vmem:[%s2095_s5] sm:$0xff] }
   0x5   :  { %1396 = vmatpush1.msk.msra.mxu0 %vm85_vm0, %v42_v0  ;;  %1402 = vmatpush1.msk.msra.mxu1 %vm85_vm0, %v43_v1  ;;  %v351_v14 = vld [vmem:[%s2096_s3 + $0x1f8] sm:$0xff]  ;;  %v318_v20 = vld [vmem:[%s2096_s3 + $0xf0] sm:$0xff]  ;;  %v623_v22 = vld [vmem:[%s2097_s7 + $0x8] sm:$0xff] }
   0x6   :  { %1397 = vmatmul.mubr.msk.f32.vlgmr.msra.gmra.mxu0 %vm72_vm1, %v38_v6  ;;  %1403 = vmatmul.mubr.msk.f32.vlgmr.msra.gmra.mxu1 %vm72_vm1, %v38_v6  ;;  %v303_v17 = vld [vmem:[%s2096_s3 + $0x78] sm:$0xff]  ;;  %v350_v21 = vld [vmem:[%s2096_s3 + $0x1f0] sm:$0xff]  ;;  %v622_v23 = vld [vmem:[%s2097_s7] sm:$0xff] }
   0x7   :  { %164 = vmatprep.mubr.f32.mxu0 %v1658_v2  ;;  %253 = vmatprep.mubr.f32.mxu1 %v1658_v2  ;;  %v335_v18 = vld [vmem:[%s2096_s3 + $0x178] sm:$0xff]  ;;  %v302_v24 = vld [vmem:[%s2096_s3 + $0x70] sm:$0xff]  ;;  %v317_v26 = vld [vmem:[%s2096_s3 + $0xe8] sm:$0xff] }
   0x8   :  { %50 = vperm.xlu0 %1652, %v44_v7   ;;  %65 = vperm.xlu1 %1653, %v47_v11   ;;  %v41_v19 = vld [vmem:[%s2093_s1 + $0x18] sm:$0xff]  ;;  %v334_v25 = vld [vmem:[%s2096_s3 + $0x170] sm:$0xff]  ;;  %v349_v27 = vld [vmem:[%s2096_s3 + $0x1e8] sm:$0xff] }
   0x9   :  { %1447 = vmatprep.subr.mxu0 %v319_v13  ;;  %1491 = vmatprep.subr.mxu1 %v351_v14  ;;  %v301_v28 = vld [vmem:[%s2096_s3 + $0x68] sm:$0xff]  ;;  %v1416_v30 = vld [vmem:[%s2095_s5 + $0x18] sm:$0xff]  ;;  %v1415_v31 = vld [vmem:[%s2095_s5 + $0x10] sm:$0xff] }
   0xa   :  { %1398 = vmatmul.mubr.msk.f32.gmra.mxu0 %vm72_vm1, %v39_v9  ;;  %1404 = vmatmul.mubr.msk.f32.gmra.mxu1 %vm72_vm1, %v39_v9  ;;  %v333_v29 = vld [vmem:[%s2096_s3 + $0x168] sm:$0xff]  ;;  %v316_v32 = vld [vmem:[%s2096_s3 + $0xe0] sm:$0xff]  ;;  %v315_v36 = vld [vmem:[%s2096_s3 + $0xd8] sm:$0xff] }
   0xb   :  { %170 = vmatprep.mubr.f32.mxu0 %v1658_v2  ;;  %259 = vmatprep.mubr.f32.mxu1 %v1658_v2  ;;  %v348_v33 = vld [vmem:[%s2096_s3 + $0x1e0] sm:$0xff]  ;;  %v347_v37 = vld [vmem:[%s2096_s3 + $0x1d8] sm:$0xff]  ;;  %v1421_v39 = vld [vmem:[%s2097_s7 + $0x10] sm:$0xff] }
   0xc   :  { %55 = vperm.xlu0 %1652, %v45_v10   ;;  %528 = vperm.xlu1 %1653, %v524_v16   ;;  %v300_v34 = vld [vmem:[%s2096_s3 + $0x60] sm:$0xff]  ;;  %v1422_v38 = vld [vmem:[%s2097_s7 + $0x18] sm:$0xff]  ;;  %v314_v42 = vld [vmem:[%s2096_s3 + $0xd0] sm:$0xff] }
   0xd   :  { %1448 = vmatpush3.msra.mxu0 %v303_v17  ;;  %1492 = vmatpush3.msra.mxu1 %v335_v18  ;;  %v332_v35 = vld [vmem:[%s2096_s3 + $0x160] sm:$0xff]  ;;  %v299_v40 = vld [vmem:[%s2096_s3 + $0x58] sm:$0xff]  ;;  %v346_v43 = vld [vmem:[%s2096_s3 + $0x1d0] sm:$0xff] }
   0xe   :  { %1399 = vmatmul.mubr.msk.f32.gmra.mxu0 %vm72_vm1, %v40_v12  ;;  %1405 = vmatmul.mubr.msk.f32.gmra.mxu1 %vm72_vm1, %v40_v12  ;;  %v331_v41 = vld [vmem:[%s2096_s3 + $0x158] sm:$0xff]  ;;  %v298_v44 = vld [vmem:[%s2096_s3 + $0x50] sm:$0xff]  ;;  %v1433_v46 = vld [vmem:[%s2095_s5 + $0x28] sm:$0xff] }
   0xf   :  { %176 = vmatprep.mubr.f32.mxu0 %v1658_v2  ;;  %265 = vmatprep.mubr.f32.mxu1 %v1658_v2  ;;  %v330_v45 = vld [vmem:[%s2096_s3 + $0x150] sm:$0xff]  ;;  %v1432_v47 = vld [vmem:[%s2095_s5 + $0x20] sm:$0xff]  ;;  %v313_v48 = vld [vmem:[%s2096_s3 + $0xc8] sm:$0xff] }
  0x10   :  { %533 = vperm.xlu0 %1652, %v525_v15   ;;  %1449 = vmatprep.subr.mxu0 %v318_v20  ;;  %v345_v49 = vld [vmem:[%s2096_s3 + $0x1c8] sm:$0xff]  ;;  %v312_v52 = vld [vmem:[%s2096_s3 + $0xc0] sm:$0xff]  ;;  %v311_v58 = vld [vmem:[%s2096_s3 + $0xb8] sm:$0xff] }
  0x11   :  { %1493 = vmatprep.subr.mxu1 %v350_v21  ;;  %626 = vperm.xlu1 %1653, %v622_v23   ;;  %v297_v50 = vld [vmem:[%s2096_s3 + $0x48] sm:$0xff]  ;;  %v344_v53 = vld [vmem:[%s2096_s3 + $0x1c0] sm:$0xff]  ;;  %v343_v59 = vld [vmem:[%s2096_s3 + $0x1b8] sm:$0xff] }
  0x12   :  { %1400 = vmatmul.mubr.msk.f32.gmra.mxu0 %vm72_vm1, %v41_v19  ;;  %1406 = vmatmul.mubr.msk.f32.gmra.mxu1 %vm72_vm1, %v41_v19  ;;  %v329_v51 = vld [vmem:[%s2096_s3 + $0x148] sm:$0xff]  ;;  %v1438_v55 = vld [vmem:[%s2097_s7 + $0x20] sm:$0xff]  ;;  %v295_v60 = vld [vmem:[%s2096_s3 + $0x38] sm:$0xff] }
  0x13   :  { %1450 = vmatpush3.msra.mxu0 %v302_v24  ;;  %1494 = vmatpush3.msra.mxu1 %v334_v25  ;;  %v1439_v54 = vld [vmem:[%s2097_s7 + $0x28] sm:$0xff]  ;;  %v296_v56 = vld [vmem:[%s2096_s3 + $0x40] sm:$0xff]  ;;  %v327_v61 = vld [vmem:[%s2096_s3 + $0x138] sm:$0xff] }
  0x14   :  { %631 = vperm.xlu0 %1652, %v623_v22   ;;  %1451 = vmatprep.subr.mxu0 %v317_v26  ;;  %v328_v57 = vld [vmem:[%s2096_s3 + $0x140] sm:$0xff]  ;;  %v310_v0 = vld [vmem:[%s2096_s3 + $0xb0] sm:$0xff]  ;;  %v309_v5 = vld [vmem:[%s2096_s3 + $0xa8] sm:$0xff] }
  0x15   :  { %1495 = vmatprep.subr.mxu1 %v349_v27  ;;  %1452 = vmatpush3.msra.mxu0 %v301_v28  ;;  %v719_v62 = vld [vmem:[%s2098_s9] sm:$0x7]  ;;  %v1426_v63 = vld [vmem:[%s2098_s9 + $0x4] sm:$0x7]  ;;  %v342_v1 = vld [vmem:[%s2096_s3 + $0x1b0] sm:$0xff] }
  0x16   :  { %1496 = vmatpush3.msra.mxu1 %v333_v29  ;;  %815 = vperm.xlu1 %1653, %v1415_v31   ;;  %v294_v3 = vld [vmem:[%s2096_s3 + $0x30] sm:$0xff]  ;;  %v341_v6 = vld [vmem:[%s2096_s3 + $0x1a8] sm:$0xff]  ;;  %v308_v10 = vld [vmem:[%s2096_s3 + $0xa0] sm:$0xff] }
  0x17   :  { %1453 = vmatprep.subr.mxu0 %v316_v32  ;;  %1497 = vmatprep.subr.mxu1 %v348_v33  ;;  %v326_v4 = vld [vmem:[%s2096_s3 + $0x130] sm:$0xff]  ;;  %v1443_v7 = vld [vmem:[%s2098_s9 + $0x8] sm:$0x7]  ;;  %v340_v11 = vld [vmem:[%s2096_s3 + $0x1a0] sm:$0xff] }
  0x18   :  { %820 = vperm.xlu0 %1652, %v1416_v30   ;;  %1454 = vmatpush3.msra.mxu0 %v300_v34  ;;  %v293_v8 = vld [vmem:[%s2096_s3 + $0x28] sm:$0xff]  ;;  %v292_v12 = vld [vmem:[%s2096_s3 + $0x20] sm:$0xff]  ;;  %v307_v14 = vld [vmem:[%s2096_s3 + $0x98] sm:$0xff] }
  0x19   :  { %1498 = vmatpush3.msra.mxu1 %v332_v35  ;;  %1455 = vmatprep.subr.mxu0 %v315_v36  ;;  %v325_v9 = vld [vmem:[%s2096_s3 + $0x128] sm:$0xff]  ;;  %v324_v13 = vld [vmem:[%s2096_s3 + $0x120] sm:$0xff]  ;;  %v339_v15 = vld [vmem:[%s2096_s3 + $0x198] sm:$0xff] }
  0x1a   :  { %1499 = vmatprep.subr.mxu1 %v347_v37  ;;  %914 = vperm.xlu1 %1653, %v1421_v39   ;;  %v291_v16 = vld [vmem:[%s2096_s3 + $0x18] sm:$0xff]  ;;  %v306_v18 = vld [vmem:[%s2096_s3 + $0x90] sm:$0xff]  ;;  %v305_v22 = vld [vmem:[%s2096_s3 + $0x88] sm:$0xff] }
  0x1b   :  { %1456 = vmatpush3.msra.mxu0 %v299_v40  ;;  %1500 = vmatpush3.msra.mxu1 %v331_v41  ;;  %v323_v17 = vld [vmem:[%s2096_s3 + $0x118] sm:$0xff]  ;;  %v338_v19 = vld [vmem:[%s2096_s3 + $0x190] sm:$0xff]  ;;  %v337_v23 = vld [vmem:[%s2096_s3 + $0x188] sm:$0xff] }
  0x1c   :  { %919 = vperm.xlu0 %1652, %v1422_v38   ;;  %1457 = vmatprep.subr.mxu0 %v314_v42  ;;  %v290_v20 = vld [vmem:[%s2096_s3 + $0x10] sm:$0xff]  ;;  %v289_v24 = vld [vmem:[%s2096_s3 + $0x8] sm:$0xff]  ;;  %v304_v26 = vld [vmem:[%s2096_s3 + $0x80] sm:$0xff] }
  0x1d   :  { %1501 = vmatprep.subr.mxu1 %v346_v43  ;;  %1458 = vmatpush3.msra.mxu0 %v298_v44  ;;  %v322_v21 = vld [vmem:[%s2096_s3 + $0x110] sm:$0xff]  ;;  %v321_v25 = vld [vmem:[%s2096_s3 + $0x108] sm:$0xff]  ;;  %v336_v27 = vld [vmem:[%s2096_s3 + $0x180] sm:$0xff] }
  0x1e   :  { %1502 = vmatpush3.msra.mxu1 %v330_v45  ;;  %1105 = vperm.xlu1 %1653, %v1432_v47   ;;  %v288_v28 = vld [vmem:[%s2096_s3] sm:$0xff] }
  0x1f   :  { %1459 = vmatprep.subr.mxu0 %v313_v48  ;;  %1503 = vmatprep.subr.mxu1 %v345_v49  ;;  %v320_v29 = vld [vmem:[%s2096_s3 + $0x100] sm:$0xff] }
  0x20   :  { %1110 = vperm.xlu0 %1652, %v1433_v46   ;;  %1460 = vmatpush3.msra.mxu0 %v297_v50 }
  0x21   :  { %1504 = vmatpush3.msra.mxu1 %v329_v51  ;;  %1461 = vmatprep.subr.mxu0 %v312_v52 }
  0x22   :  { %1505 = vmatprep.subr.mxu1 %v344_v53  ;;  %1204 = vperm.xlu1 %1653, %v1438_v55  }
  0x23   :  { %1462 = vmatpush3.msra.mxu0 %v296_v56  ;;  %1506 = vmatpush3.msra.mxu1 %v328_v57 }
  0x24   :  { %1209 = vperm.xlu0 %1652, %v1439_v54   ;;  %1463 = vmatprep.subr.mxu0 %v311_v58 }
  0x25   :  { %1507 = vmatprep.subr.mxu1 %v343_v59  ;;  %1464 = vmatpush3.msra.mxu0 %v295_v60 }
  0x26   :  { %1508 = vmatpush3.msra.mxu1 %v327_v61  ;;  %1011 = vperm.xlu1 %1653, %v1426_v63  }
  0x27   :  { %1465 = vmatprep.subr.mxu0 %v310_v0  ;;  %1509 = vmatprep.subr.mxu1 %v342_v1 }
  0x28   :  { %722 = vperm.xlu0 %1652, %v719_v62   ;;  %1466 = vmatpush3.msra.mxu0 %v294_v3 }
  0x29   :  { %1510 = vmatpush3.msra.mxu1 %v326_v4  ;;  %1467 = vmatprep.subr.mxu0 %v309_v5 }
  0x2a   :  { %1511 = vmatprep.subr.mxu1 %v341_v6  ;;  %1468 = vmatpush3.msra.mxu0 %v293_v8 }
  0x2b   :  { %1512 = vmatpush3.msra.mxu1 %v325_v9  ;;  %1469 = vmatprep.subr.mxu0 %v308_v10 }
  0x2c   :  { %1301 = vperm.xlu0 %1652, %v1443_v7   ;;  %1513 = vmatprep.subr.mxu1 %v340_v11 }
  0x2d   :  { %1470 = vmatpush3.msra.mxu0 %v292_v12  ;;  %1514 = vmatpush3.msra.mxu1 %v324_v13 }
  0x2e   :  { %1471 = vmatprep.subr.mxu0 %v307_v14  ;;  %1515 = vmatprep.subr.mxu1 %v339_v15 }
  0x2f   :  { %1472 = vmatpush3.msra.mxu0 %v291_v16  ;;  %1516 = vmatpush3.msra.mxu1 %v323_v17 }
  0x30   :  { %1473 = vmatprep.subr.mxu0 %v306_v18  ;;  %1517 = vmatprep.subr.mxu1 %v338_v19  ;;  %v522_v19 = vld [vmem:[%s2099_s4] sm:$0xff] }
  0x31   :  { %1474 = vmatpush3.msra.mxu0 %v290_v20  ;;  %1518 = vmatpush3.msra.mxu1 %v322_v21 }
  0x32   :  { %1475 = vmatprep.subr.mxu0 %v305_v22  ;;  %1519 = vmatprep.subr.mxu1 %v337_v23 }
  0x33   :  { %1476 = vmatpush3.msra.mxu0 %v289_v24  ;;  %1520 = vmatpush3.msra.mxu1 %v321_v25 }
  0x34   :  { %1477 = vmatprep.subr.mxu0 %v304_v26  ;;  %1521 = vmatprep.subr.mxu1 %v336_v27 }
  0x35   :  { %1478 = vmatpush3.msra.mxu0 %v288_v28  ;;  %1522 = vmatpush3.msra.mxu1 %v320_v29 }
  0x7e   :  { %v61_v50 = vpop.permute.xlu1 %60 }
  0x83   :  { %v51_v30 = vpop.permute.xlu0 %50  ;;  %v66_v4 = vpop.permute.xlu1 %65 }
  0x87   :  { %v56_v41 = vpop.permute.xlu0 %55 }
  0xc6   :  { %v160_v31 = vpop.f32.mrf.mxu0  ;;  %v249_v32 = vpop.f32.mrf.mxu1 }
  0xc7   :  { %v161_v33 = vadd.f32 %v160_v31, %v51_v30  ;;  %v250_v34 = vadd.f32 %v249_v32, %v51_v30 }
  0xc8   :  { %v162_v35 = vpop.f32.mrf.mxu0  ;;  %v251_v36 = vpop.f32.mrf.mxu1 }
  0xc9   :  { %v163_v37 = vadd.f32 %v162_v35, %v51_v30  ;;  %v252_v38 = vadd.f32 %v251_v36, %v51_v30  ;;  %v272_v44 = vmax.f32 %v161_v33, 0.0  ;;  %v274_v45 = vmax.f32 %v250_v34, 0.0 }
  0xca   :  { %v166_v39 = vpop.f32.mrf.mxu0  ;;  %v255_v40 = vpop.f32.mrf.mxu1 }
  0xcb   :  { %v273_v42 = vmax.f32 %v163_v37, 0.0  ;;  %v275_v43 = vmax.f32 %v252_v38, 0.0  ;;  %v167_v46 = vadd.f32 %v166_v39, %v56_v41  ;;  %v256_v47 = vadd.f32 %v255_v40, %v56_v41 }
  0xcc   :  { %v168_v48 = vpop.f32.mrf.mxu0  ;;  %v257_v49 = vpop.f32.mrf.mxu1 }
  0xcd   :  { %v169_v51 = vadd.f32 %v168_v48, %v56_v41  ;;  %v258_v52 = vadd.f32 %v257_v49, %v56_v41  ;;  %416 = vmatprep.mubr.f32.mxu0 %v273_v42  ;;  %501 = vmatprep.mubr.f32.mxu1 %v275_v43  ;;  %v276_v57 = vmax.f32 %v167_v46, 0.0  ;;  %v278_v58 = vmax.f32 %v256_v47, 0.0  ;;  %v523_v48 = vld [vmem:[%s2099_s4 + $0x8] sm:$0xff]  ;;  %v620_v49 = vld [vmem:[%s2100_s6] sm:$0xff] }
  0xce   :  { %v172_v53 = vpop.f32.mrf.mxu0  ;;  %v261_v54 = vpop.f32.mrf.mxu1  ;;  %417 = vmatmul.mubr.f32.vlgmr.msra.gmra.mxu0 %v272_v44  ;;  %502 = vmatmul.mubr.f32.vlgmr.msra.gmra.mxu1 %v274_v45 }
  0xcf   :  { %v277_v55 = vmax.f32 %v169_v51, 0.0  ;;  %v279_v56 = vmax.f32 %v258_v52, 0.0  ;;  %v173_v59 = vadd.f32 %v172_v53, %v61_v50  ;;  %v262_v60 = vadd.f32 %v261_v54, %v61_v50  ;;  %v529_v53 = vpop.permute.xlu1 %528 }
  0xd0   :  { %v174_v61 = vpop.f32.mrf.mxu0  ;;  %v263_v62 = vpop.f32.mrf.mxu1 }
  0xd1   :  { %v175_v63 = vadd.f32 %v174_v61, %v61_v50  ;;  %v264_v0 = vadd.f32 %v263_v62, %v61_v50  ;;  %421 = vmatprep.mubr.f32.mxu0 %v277_v55  ;;  %506 = vmatprep.mubr.f32.mxu1 %v279_v56  ;;  %v280_v7 = vmax.f32 %v173_v59, 0.0  ;;  %v282_v8 = vmax.f32 %v262_v60, 0.0  ;;  %v534_v50 = vpop.permute.xlu0 %533  ;;  %v1413_v59 = vld [vmem:[%s2099_s4 + $0x10] sm:$0xff]  ;;  %v1414_v60 = vld [vmem:[%s2099_s4 + $0x18] sm:$0xff]  ;;  %v1430_v61 = vld [vmem:[%s2099_s4 + $0x20] sm:$0xff] }
  0xd2   :  { %v178_v1 = vpop.f32.mrf.mxu0  ;;  %v267_v3 = vpop.f32.mrf.mxu1  ;;  %422 = vmatmul.mubr.f32.gmra.mxu0 %v276_v57  ;;  %507 = vmatmul.mubr.f32.gmra.mxu1 %v278_v58  ;;  %v621_v58 = vld [vmem:[%s2100_s6 + $0x8] sm:$0xff] }
  0xd3   :  { %v281_v5 = vmax.f32 %v175_v63, 0.0  ;;  %v283_v6 = vmax.f32 %v264_v0, 0.0  ;;  %v179_v9 = vadd.f32 %v178_v1, %v66_v4  ;;  %v268_v10 = vadd.f32 %v267_v3, %v66_v4  ;;  %v1431_v62 = vld [vmem:[%s2099_s4 + $0x28] sm:$0xff]  ;;  %v627_v3 = vpop.permute.xlu1 %626 }
  0xd4   :  { %v180_v11 = vpop.f32.mrf.mxu0  ;;  %v269_v12 = vpop.f32.mrf.mxu1 }
  0xd5   :  { %v181_v13 = vadd.f32 %v180_v11, %v66_v4  ;;  %v270_v14 = vadd.f32 %v269_v12, %v66_v4  ;;  %426 = vmatprep.mubr.f32.mxu0 %v281_v5  ;;  %511 = vmatprep.mubr.f32.mxu1 %v283_v6  ;;  %v284_v17 = vmax.f32 %v179_v9, 0.0  ;;  %v286_v18 = vmax.f32 %v268_v10, 0.0  ;;  %v632_v63 = vpop.permute.xlu0 %631  ;;  %v1419_v9 = vld [vmem:[%s2100_s6 + $0x10] sm:$0xff] }
  0xd6   :  { %427 = vmatmul.mubr.f32.gmra.mxu0 %v280_v7  ;;  %512 = vmatmul.mubr.f32.gmra.mxu1 %v282_v8  ;;  %v718_v8 = vld [vmem:[%s2101_s8] sm:$0x7] }
  0xd7   :  { %v285_v15 = vmax.f32 %v181_v13, 0.0  ;;  %v287_v16 = vmax.f32 %v270_v14, 0.0  ;;  %v816_v13 = vpop.permute.xlu1 %815 }
  0xd9   :  { %431 = vmatprep.mubr.f32.mxu0 %v285_v15  ;;  %516 = vmatprep.mubr.f32.mxu1 %v287_v16  ;;  %v821_v10 = vpop.permute.xlu0 %820 }
  0xda   :  { %432 = vmatmul.mubr.f32.gmra.mxu0 %v284_v17  ;;  %517 = vmatmul.mubr.f32.gmra.mxu1 %v286_v18  ;;  %v1420_v18 = vld [vmem:[%s2100_s6 + $0x18] sm:$0xff] }
  0xdb   :  { %1582 = vmatprep.mubr.msk.f32.mxu0 %vm536_vm2, %v522_v19  ;;  %1589 = vmatprep.mubr.msk.f32.mxu1 %vm634_vm3, %v620_v49 }
 0x18e   :  { %v1479_v20 = vpop.f32.mrf.mxu0  ;;  %v1523_v21 = vpop.f32.mrf.mxu1 }
 0x190   :  { %v1480_v22 = vpop.f32.mrf.mxu0  ;;  %v1524_v23 = vpop.f32.mrf.mxu1 }
 0x191   :  { %v1481_v43 = vadd.f32 %v1480_v22, %v1479_v20  ;;  %v1525_v44 = vadd.f32 %v1524_v23, %v1523_v21  ;;  %v920_v21 = vpop.permute.xlu0 %919  ;;  %v915_v22 = vpop.permute.xlu1 %914 }
 0x192   :  { %v1482_v24 = vpop.f32.mrf.mxu0  ;;  %v1526_v25 = vpop.f32.mrf.mxu1 }
 0x193   :  { %v504_v47 = vadd.f32 %v1525_v44, %v1481_v43 }
 0x194   :  { %v1483_v26 = vpop.f32.mrf.mxu0  ;;  %v1527_v27 = vpop.f32.mrf.mxu1 }
 0x195   :  { %v1484_v40 = vadd.f32 %v1483_v26, %v1482_v24  ;;  %v1528_v41 = vadd.f32 %v1527_v27, %v1526_v25  ;;  %v1111_v25 = vpop.permute.xlu0 %1110 }
 0x196   :  { %v1485_v28 = vpop.f32.mrf.mxu0  ;;  %v1529_v29 = vpop.f32.mrf.mxu1 }
 0x197   :  { %v509_v46 = vadd.f32 %v1528_v41, %v1484_v40 }
 0x198   :  { %v1486_v30 = vpop.f32.mrf.mxu0  ;;  %v1530_v31 = vpop.f32.mrf.mxu1 }
 0x199   :  { %v1487_v36 = vadd.f32 %v1486_v30, %v1485_v28  ;;  %v1531_v37 = vadd.f32 %v1530_v31, %v1529_v29  ;;  %v1106_v30 = vpop.permute.xlu1 %1105  ;;  %v1210_v40 = vpop.permute.xlu0 %1209 }
 0x19a   :  { %v1488_v32 = vpop.f32.mrf.mxu0  ;;  %v1532_v33 = vpop.f32.mrf.mxu1 }
 0x19b   :  { %v514_v45 = vadd.f32 %v1531_v37, %v1487_v36  ;;  %v1436_v37 = vld [vmem:[%s2100_s6 + $0x20] sm:$0xff] }
 0x19c   :  { %v1489_v34 = vpop.f32.mrf.mxu0  ;;  %v1533_v35 = vpop.f32.mrf.mxu1 }
 0x19d   :  { %v1490_v38 = vadd.f32 %v1489_v34, %v1488_v32  ;;  %v1534_v39 = vadd.f32 %v1533_v35, %v1532_v33  ;;  %v1425_v35 = vld [vmem:[%s2101_s8 + $0x4] sm:$0x7]  ;;  %v1205_v41 = vpop.permute.xlu1 %1204 }
 0x19f   :  { %v519_v42 = vadd.f32 %v1534_v39, %v1490_v38  ;;  %v1437_v39 = vld [vmem:[%s2100_s6 + $0x28] sm:$0xff] }
 0x1a1   :  { %1574 = vmatprep.subr.mxu0 %v519_v42  ;;  %v1012_v44 = vpop.permute.xlu1 %1011 }
 0x1a2   :  { %1575 = vmatpush3.msra.mxu0 %v519_v42 }
 0x1a3   :  { %1576 = vmatprep.subr.mxu0 %v514_v45 }
 0x1a4   :  { %1577 = vmatpush3.msra.mxu0 %v514_v45 }
 0x1a5   :  { %1578 = vmatprep.subr.mxu0 %v509_v46 }
 0x1a6   :  { %1579 = vmatpush3.msra.mxu0 %v509_v46 }
 0x1a7   :  { %1580 = vmatprep.subr.mxu0 %v504_v47 }
 0x1a8   :  { %1581 = vmatpush3.msra.mxu0 %v504_v47 }
 0x1a9   :  { %1583 = vmatmul.mubr.msk.f32.vlgmr.msra.gmra.mxu0 %vm536_vm2, %v523_v48  ;;  %1592 = vmatprep.subr.mxu0 %v1658_v2 }
 0x1aa   :  { %1596 = vmatprep.mubr.msk.f32.mxu0 %vm1660_vm4, %v1658_v2 }
 0x269   :  { %v1584_v51 = vpop.f32.mrf.mxu0 }
 0x26a   :  { %v615_v52 = vadd.f32 %v1584_v51, %v534_v50 }
 0x26b   :  { %v609_v54 = vpop.f32.mrf.mxu0 }
 0x26c   :  { %v619_v55 = vmax.f32 %v615_v52, 0.0  ;;  %v610_v56 = vadd.f32 %v609_v54, %v529_v53 }
 0x26e   :  { %v618_v57 = vmax.f32 %v610_v56, 0.0  ;;  %1585 = vmatprep.subr.mxu1 %v619_v55 }
 0x26f   :  { %1586 = vmatpush3.msra.mxu1 %v619_v55 }
 0x270   :  { %1587 = vmatprep.subr.mxu1 %v618_v57 }
 0x271   :  { %1588 = vmatpush3.msra.mxu1 %v618_v57 }
 0x272   :  { %1590 = vmatmul.mubr.msk.f32.vlgmr.msra.gmra.mxu1 %vm634_vm3, %v621_v58  ;;  %1599 = vmatprep.subr.mxu1 %v519_v42 }
 0x273   :  { %1600 = vmatpush3.msra.mxu1 %v519_v42  ;;  %1607 = vmatprep.mubr.msk.f32.mxu1 %vm536_vm2, %v1413_v59  ;;  %v1442_v59 = vld [vmem:[%s2101_s8 + $0x8] sm:$0x7] }
 0x274   :  { %1601 = vmatprep.subr.mxu1 %v514_v45 }
 0x275   :  { %1602 = vmatpush3.msra.mxu1 %v514_v45 }
 0x276   :  { %1603 = vmatprep.subr.mxu1 %v509_v46 }
 0x277   :  { %1604 = vmatpush3.msra.mxu1 %v509_v46 }
 0x278   :  { %1605 = vmatprep.subr.mxu1 %v504_v47 }
 0x279   :  { %1606 = vmatpush3.msra.mxu1 %v504_v47 }
 0x27a   :  { %1608 = vmatmul.mubr.msk.f32.vlgmr.msra.gmra.mxu1 %vm536_vm2, %v1414_v60  ;;  %1624 = vmatprep.subr.mxu1 %v519_v42 }
 0x27b   :  { %1625 = vmatpush3.msra.mxu1 %v519_v42  ;;  %1632 = vmatprep.mubr.msk.f32.mxu1 %vm536_vm2, %v1430_v61  ;;  %v723_v42 = vpop.permute.xlu0 %722 }
 0x27c   :  { %1626 = vmatprep.subr.mxu1 %v514_v45 }
 0x27d   :  { %1627 = vmatpush3.msra.mxu1 %v514_v45  ;;  %v1412_v45 = vld [vmem:[%s2102_s10] ss:$0 sm:$0xff] }
 0x27e   :  { %1628 = vmatprep.subr.mxu1 %v509_v46 }
 0x27f   :  { %1629 = vmatpush3.msra.mxu1 %v509_v46  ;;  %v1302_v60 = vpop.permute.xlu0 %1301 }
 0x280   :  { %1630 = vmatprep.subr.mxu1 %v504_v47 }
 0x281   :  { %1631 = vmatpush3.msra.mxu1 %v504_v47  ;;  %v1429_v47 = vld [vmem:[%s2102_s10 + $0x1] ss:$0 sm:$0xff] }
 0x282   :  { %1633 = vmatmul.mubr.msk.f32.vlgmr.msra.gmra.mxu1 %vm536_vm2, %v1431_v62  ;;  %v1446_v62 = vld [vmem:[%s2102_s10 + $0x2] ss:$0 sm:$0xff] }
 0x332   :  { %v1591_v0 = vpop.f32.mrf.mxu1 }
 0x333   :  { %v713_v1 = vadd.f32 %v1591_v0, %v632_v63 }
 0x334   :  { %v707_v4 = vpop.f32.mrf.mxu1 }
 0x335   :  { %v717_v5 = vmax.f32 %v713_v1, 0.0  ;;  %v708_v6 = vadd.f32 %v707_v4, %v627_v3 }
 0x337   :  { %v716_v7 = vmax.f32 %v708_v6, 0.0  ;;  %1593 = vmatpush3.msra.mxu0 %v717_v5 }
 0x338   :  { %1594 = vmatprep.subr.mxu0 %v1658_v2 }
 0x339   :  { %1595 = vmatpush3.msra.mxu0 %v716_v7 }
 0x33a   :  { %1597 = vmatmul.mubr.msk.f32.vlgmr.msra.gmra.mxu0 %vm634_vm3, %v718_v8  ;;  %v1609_v11 = vpop.f32.mrf.mxu1 }
 0x33b   :  { %v901_v12 = vadd.f32 %v1609_v11, %v821_v10  ;;  %1614 = vmatprep.mubr.msk.f32.mxu0 %vm634_vm3, %v1419_v9 }
 0x33c   :  { %v895_v14 = vpop.f32.mrf.mxu1 }
 0x33d   :  { %v905_v15 = vmax.f32 %v901_v12, 0.0  ;;  %v896_v16 = vadd.f32 %v895_v14, %v816_v13 }
 0x33f   :  { %v904_v17 = vmax.f32 %v896_v16, 0.0  ;;  %1610 = vmatprep.subr.mxu0 %v905_v15 }
 0x340   :  { %1611 = vmatpush3.msra.mxu0 %v905_v15 }
 0x341   :  { %1612 = vmatprep.subr.mxu0 %v904_v17 }
 0x342   :  { %1613 = vmatpush3.msra.mxu0 %v904_v17  ;;  %v1634_v23 = vpop.f32.mrf.mxu1 }
 0x343   :  { %1615 = vmatmul.mubr.msk.f32.vlgmr.msra.gmra.mxu0 %vm634_vm3, %v1420_v18  ;;  %1617 = vmatprep.subr.mxu0 %v1658_v2  ;;  %v1191_v28 = vadd.f32 %v1634_v23, %v1111_v25 }
 0x344   :  { %1621 = vmatprep.mubr.msk.f32.mxu0 %vm1660_vm4, %v1658_v2  ;;  %v1185_v26 = vpop.f32.mrf.mxu1 }
 0x345   :  { %v1186_v33 = vadd.f32 %v1185_v26, %v1106_v30  ;;  %v1195_v36 = vmax.f32 %v1191_v28, 0.0 }
 0x347   :  { %v1194_v38 = vmax.f32 %v1186_v33, 0.0 }
 0x3fa   :  { %v794_v19 = vpop.f32.mrf.mxu0 }
 0x3fb   :  { %v795_v43 = vadd.f32 %v794_v19, %v723_v42 }
 0x3fc   :  { %v1598_v20 = vpop.f32.mrf.mxu0 }
 0x3fd   :  { %v805_v50 = vmul.f32 %v1412_v45, %v795_v43 }
 0x403   :  { %v1616_v24 = vpop.f32.mrf.mxu0 }
 0x404   :  { %v1000_v27 = vadd.f32 %v1616_v24, %v920_v21 }
 0x405   :  { %v994_v29 = vpop.f32.mrf.mxu0 }
 0x406   :  { %v1004_v31 = vmax.f32 %v1000_v27, 0.0  ;;  %v995_v32 = vadd.f32 %v994_v29, %v915_v22 }
 0x408   :  { %v1003_v34 = vmax.f32 %v995_v32, 0.0  ;;  %1618 = vmatpush3.msra.mxu0 %v1004_v31 }
 0x409   :  { %1619 = vmatprep.subr.mxu0 %v1658_v2 }
 0x40a   :  { %1620 = vmatpush3.msra.mxu0 %v1003_v34 }
 0x40b   :  { %1622 = vmatmul.mubr.msk.f32.vlgmr.msra.gmra.mxu0 %vm634_vm3, %v1425_v35  ;;  %1635 = vmatprep.subr.mxu0 %v1195_v36 }
 0x40c   :  { %1636 = vmatpush3.msra.mxu0 %v1195_v36  ;;  %1639 = vmatprep.mubr.msk.f32.mxu0 %vm634_vm3, %v1436_v37 }
 0x40d   :  { %1637 = vmatprep.subr.mxu0 %v1194_v38 }
 0x40e   :  { %1638 = vmatpush3.msra.mxu0 %v1194_v38 }
 0x40f   :  { %1640 = vmatmul.mubr.msk.f32.vlgmr.msra.gmra.mxu0 %vm634_vm3, %v1437_v39  ;;  %1642 = vmatprep.subr.mxu0 %v1658_v2 }
 0x410   :  { %1646 = vmatprep.mubr.msk.f32.mxu0 %vm1660_vm4, %v1658_v2 }
 0x4cb   :  { %v1083_v46 = vpop.f32.mrf.mxu0 }
 0x4cc   :  { %v1084_v48 = vadd.f32 %v1083_v46, %v1012_v44 }
 0x4cd   :  { %v1623_v49 = vpop.f32.mrf.mxu0 }
 0x4ce   :  { %v1095_v51 = vmul.f32 %v1429_v47, %v1084_v48 }
 0x4cf   :  { %v1641_v52 = vpop.f32.mrf.mxu0 }
 0x4d0   :  { %v1096_v53 = vadd.f32 %v1095_v51, %v805_v50  ;;  %v1290_v54 = vadd.f32 %v1641_v52, %v1210_v40 }
 0x4d1   :  { %v1284_v55 = vpop.f32.mrf.mxu0 }
 0x4d2   :  { %v1294_v56 = vmax.f32 %v1290_v54, 0.0  ;;  %v1285_v57 = vadd.f32 %v1284_v55, %v1205_v41 }
 0x4d4   :  { %v1293_v58 = vmax.f32 %v1285_v57, 0.0  ;;  %1643 = vmatpush3.msra.mxu0 %v1294_v56 }
 0x4d5   :  { %1644 = vmatprep.subr.mxu0 %v1658_v2 }
 0x4d6   :  { %1645 = vmatpush3.msra.mxu0 %v1293_v58 }
 0x4d7   :  { %1647 = vmatmul.mubr.msk.f32.vlgmr.msra.gmra.mxu0 %vm634_vm3, %v1442_v59 }
 0x597   :  { %v1373_v61 = vpop.f32.mrf.mxu0 }
 0x598   :  { %v1374_v63 = vadd.f32 %v1373_v61, %v1302_v60 }
 0x599   :  { %v1648_v0 = vpop.f32.mrf.mxu0 }
 0x59a   :  { %v1385_v1 = vmul.f32 %v1446_v62, %v1374_v63 }
 0x59c   :  { %v1386_v3 = vadd.f32 %v1385_v1, %v1096_v53 }
 0x59e   :  { %1656 = vtanh.f32 %v1386_v3 }
 0x5ab   :  { %v1657_v4 = vpop.eup %1656 }
 0x5ac   :  { %v1388_v5 = vmul.f32 3.1415927, %v1657_v4 }
 0x5ae   :  { %1390 = vst.msk [vmem:[%s2103_s11] sm:$0x7] %vm1389_vm5, %v1388_v5 }

</bundles_post_ra>
